<compile_context>
chip_gen: v7x
topology: tpu7x:2x2x1
jax: 0.10.0
libtpu: 0.0.40
codegen_flags: <defaults>
</compile_context>

<pallas_src>
import functools

import jax
import jax.numpy as jnp
from jax.experimental import pallas as pl
from jax.experimental.pallas import tpu as pltpu


def _round_up(x, m):
    return -(-x // m) * m


def _focal_loss_kernel(logits_ref, targets_ref, out_ref, *,
                       gamma, mask_last, n_valid_last):
    """One row tile: writes sum_i (1 - pt_i)**gamma * ce_i (alpha applied in wrapper)."""
    x = logits_ref[...].astype(jnp.float32)            # (tile_n, C)
    t = targets_ref[...]                                # (tile_n, 1) int32

    # Numerically-stable softmax pieces: single full-tile exp.
    m = jnp.max(x, axis=-1, keepdims=True)              # (tile_n, 1)
    e = jnp.exp(x - m)                                   # (tile_n, C)
    sumexp = jnp.sum(e, axis=-1, keepdims=True)          # (tile_n, 1)

    # Target-class gather via one-hot select (no dynamic gather on TPU).
    # TODO(synk): out-of-range targets silently contribute 0 here, whereas
    # torch.nn.functional.cross_entropy would raise an error.
    onehot = jax.lax.broadcasted_iota(jnp.int32, x.shape, 1) == t
    tgt_logit = jnp.sum(jnp.where(onehot, x, 0.0), axis=-1, keepdims=True)
    tgt_e = jnp.sum(jnp.where(onehot, e, 0.0), axis=-1, keepdims=True)

    ce = jnp.maximum(jnp.log(sumexp) + m - tgt_logit, 0.0)   # per-row CE >= 0
    pt = tgt_e / sumexp                                       # == exp(-ce); reuses exp table
    u = 1.0 - pt                                              # in [0, 1]

    g = float(gamma)
    if g == int(g) and 0 <= int(g) <= 8:
        w = jnp.ones_like(u)
        for _ in range(int(g)):
            w = w * u                                         # VPU muls, no EUP pow
    else:
        w = jnp.power(u, jnp.float32(g))
    loss = w * ce                                             # (tile_n, 1)

    def _write(vec):
        total = jnp.sum(vec, axis=0, keepdims=True)           # (1, 1) partial sum
        out_ref[...] = jnp.broadcast_to(total, out_ref.shape)

    if not mask_last:
        # N divides evenly into tiles: zero masking work on every step.
        _write(loss)
    else:
        is_last = pl.program_id(0) == pl.num_programs(0) - 1

        @pl.when(jnp.logical_not(is_last))
        def _():
            _write(loss)

        @pl.when(is_last)
        def _():
            # Ragged last tile: rows past N hold garbage from the clamped DMA.
            rows = jax.lax.broadcasted_iota(jnp.int32, loss.shape, 0)
            _write(jnp.where(rows < n_valid_last, loss, 0.0))


def focal_loss(logits, targets, *, alpha=0.25, gamma=2.0, reduction="mean",
               tile_rows=None):
    """Pallas TPU focal loss.  logits: (N, C) float, targets: (N,) int."""
    assert reduction in ("mean", "sum")
    N, C = logits.shape
    itemsize = jnp.dtype(logits.dtype).itemsize
    c_lanes = _round_up(C, 128)          # lane-padded width of one row in VMEM

    # Row tile: ~2 MiB f32 compute tile; multiple of 32 (bf16/int8 sublane
    # packing safe), or the full N when N is small (block dim == array dim).
    if tile_rows is None:
        tile_rows = max(32, (2 << 20) // (c_lanes * 4))
    tile_rows = max(32, (int(tile_rows) // 32) * 32)
    if tile_rows > N:
        tile_rows = N

    num_tiles = int(pl.cdiv(N, tile_rows))
    n_valid_last = N - (num_tiles - 1) * tile_rows
    mask_last = n_valid_last != tile_rows

    targets2d = targets.astype(jnp.int32).reshape(N, 1)

    kernel = functools.partial(
        _focal_loss_kernel, gamma=float(gamma),
        mask_last=bool(mask_last), n_valid_last=int(n_valid_last))

    # VMEM budget: double-buffered logits + lane-padded (tile_rows, 128)
    # targets buffers + output block, plus headroom for the f32 in-kernel
    # temporaries (a handful of (tile_rows, c_lanes) tiles).
    compute_tile = tile_rows * c_lanes * 4
    buffers = (2 * tile_rows * c_lanes * itemsize      # logits double buffer
               + 2 * tile_rows * 128 * 4               # targets, lane-padded
               + 2 * 128 * 4)                          # output block
    vmem_limit = int(min(max(buffers + 12 * compute_tile, 32 << 20), 48 << 20))

    out = pl.pallas_call(
        kernel,
        out_shape=jax.ShapeDtypeStruct((num_tiles, 1, 128), jnp.float32),
        grid=(num_tiles,),
        in_specs=[
            pl.BlockSpec((tile_rows, C), lambda i: (i, 0)),
            pl.BlockSpec((tile_rows, 1), lambda i: (i, 0)),
        ],
        out_specs=pl.BlockSpec((1, 1, 128), lambda i: (i, 0, 0)),
        compiler_params=pltpu.CompilerParams(
            dimension_semantics=("parallel",),
            vmem_limit_bytes=vmem_limit),
    )(logits, targets2d)

    # Combine per-tile partial sums; fold alpha / mean into the final scalar.
    total = jnp.sum(out[:, 0, 0]) * jnp.float32(alpha)
    if reduction == "mean":
        total = total / jnp.float32(N)
    return total


def _focal_loss_ref(logits, targets, alpha=0.25, gamma=2.0, reduction="mean"):
    logp = jax.nn.log_softmax(logits.astype(jnp.float32), axis=-1)
    ce = -jnp.take_along_axis(logp, targets[:, None].astype(jnp.int32),
                              axis=-1)[:, 0]
    pt = jnp.exp(-ce)
    loss = alpha * (1.0 - pt) ** gamma * ce
    return loss.mean() if reduction == "mean" else loss.sum()


if __name__ == "__main__":
    key = jax.random.PRNGKey(0)
    k1, k2 = jax.random.split(key)

    # Small single-tile case (batch of 16 samples, 10 classes).
    N, C = 16, 10
    logits = jax.random.normal(k1, (N, C), dtype=jnp.float32)
    targets = jax.random.randint(k2, (N,), 0, C, dtype=jnp.int32)

    out = focal_loss(logits, targets, alpha=0.25, gamma=2.0, reduction="mean")
    out = jax.block_until_ready(out)
    ref = _focal_loss_ref(logits, targets, 0.25, 2.0, "mean")
    assert jnp.allclose(out, ref, rtol=1e-5, atol=1e-5), (out, ref)

    # Multi-tile case with a ragged last tile (exercises the row mask path).
    k3, k4 = jax.random.split(k2)
    N2, C2 = 100, 10
    logits2 = jax.random.normal(k3, (N2, C2), dtype=jnp.float32)
    targets2 = jax.random.randint(k4, (N2,), 0, C2, dtype=jnp.int32)

    out2 = focal_loss(logits2, targets2, alpha=0.25, gamma=2.0,
                      reduction="sum", tile_rows=32)
    out2 = jax.block_until_ready(out2)
    ref2 = _focal_loss_ref(logits2, targets2, 0.25, 2.0, "sum")
    assert jnp.allclose(out2, ref2, rtol=1e-5, atol=1e-4), (out2, ref2)

    print("KERNEL_OK")
</pallas_src>

<mosaic_0001>
module attributes {stable_mosaic.version = 11 : i64} {
  func.func @_focal_loss_kernel(%arg0: i32, %arg1: memref<16x10xf32, #tpu.memory_space<vmem>>, %arg2: memref<16x1xi32, #tpu.memory_space<vmem>>, %arg3: memref<1x1x128xf32, #tpu.memory_space<vmem>>) attributes {dimension_semantics = [#tpu.dimension_semantics<parallel>], iteration_bounds = array<i64: 1>, scalar_prefetch = 0 : i64, scratch_operands = 0 : i64, tpu.core_type = #tpu.core_type<tc>, window_params = [{transform_indices = @transform_0, window_bounds = array<i64: 16, 10>}, {transform_indices = @transform_1, window_bounds = array<i64: 16, 1>}, {transform_indices = @transform_2, window_bounds = array<i64: 1, 1, 128>}]} {
    %c0 = arith.constant 0 : index
    %c0_0 = arith.constant 0 : index
    %0 = vector.load %arg1[%c0, %c0_0] : memref<16x10xf32, #tpu.memory_space<vmem>>, vector<16x10xf32>
    %c0_1 = arith.constant 0 : index
    %c0_2 = arith.constant 0 : index
    %1 = vector.load %arg2[%c0_1, %c0_2] : memref<16x1xi32, #tpu.memory_space<vmem>>, vector<16x1xi32>
    %cst = arith.constant dense<0xFF800000> : vector<16xf32>
    %2 = vector.multi_reduction <maximumf>, %0, %cst [1] : vector<16x10xf32> to vector<16xf32>
    %3 = vector.shape_cast %2 : vector<16xf32> to vector<16x1xf32>
    %4 = vector.broadcast %3 : vector<16x1xf32> to vector<16x10xf32>
    %5 = arith.subf %0, %4 : vector<16x10xf32>
    %6 = math.exp %5 : vector<16x10xf32>
    %cst_3 = arith.constant dense<0.000000e+00> : vector<16xf32>
    %7 = vector.multi_reduction <add>, %6, %cst_3 [1] : vector<16x10xf32> to vector<16xf32>
    %8 = vector.shape_cast %7 : vector<16xf32> to vector<16x1xf32>
    %9 = tpu.iota {dimensions = array<i32: 1>} : vector<16x10xi32>
    %10 = vector.broadcast %1 : vector<16x1xi32> to vector<16x10xi32>
    %11 = arith.cmpi eq, %9, %10 : vector<16x10xi32>
    %cst_4 = arith.constant 0.000000e+00 : f32
    %12 = vector.broadcast %cst_4 : f32 to vector<16x10xf32>
    %13 = arith.select %11, %0, %12 : vector<16x10xi1>, vector<16x10xf32>
    %cst_5 = arith.constant dense<0.000000e+00> : vector<16xf32>
    %14 = vector.multi_reduction <add>, %13, %cst_5 [1] : vector<16x10xf32> to vector<16xf32>
    %15 = vector.shape_cast %14 : vector<16xf32> to vector<16x1xf32>
    %cst_6 = arith.constant 0.000000e+00 : f32
    %16 = vector.broadcast %cst_6 : f32 to vector<16x10xf32>
    %17 = arith.select %11, %6, %16 : vector<16x10xi1>, vector<16x10xf32>
    %cst_7 = arith.constant dense<0.000000e+00> : vector<16xf32>
    %18 = vector.multi_reduction <add>, %17, %cst_7 [1] : vector<16x10xf32> to vector<16xf32>
    %19 = vector.shape_cast %18 : vector<16xf32> to vector<16x1xf32>
    %20 = math.log %8 : vector<16x1xf32>
    %21 = arith.addf %20, %3 : vector<16x1xf32>
    %22 = arith.subf %21, %15 : vector<16x1xf32>
    %cst_8 = arith.constant 0.000000e+00 : f32
    %23 = vector.broadcast %cst_8 : f32 to vector<16x1xf32>
    %24 = arith.maximumf %22, %23 : vector<16x1xf32>
    %25 = arith.divf %19, %8 : vector<16x1xf32>
    %cst_9 = arith.constant 1.000000e+00 : f32
    %26 = vector.broadcast %cst_9 : f32 to vector<16x1xf32>
    %27 = arith.subf %26, %25 : vector<16x1xf32>
    %cst_10 = arith.constant 1.000000e+00 : f32
    %28 = vector.broadcast %cst_10 : f32 to vector<16x1xf32>
    %29 = arith.mulf %28, %27 : vector<16x1xf32>
    %30 = arith.mulf %29, %27 : vector<16x1xf32>
    %31 = arith.mulf %30, %24 : vector<16x1xf32>
    %cst_11 = arith.constant dense<0.000000e+00> : vector<1xf32>
    %32 = vector.multi_reduction <add>, %31, %cst_11 [0] : vector<16x1xf32> to vector<1xf32>
    %33 = vector.shape_cast %32 : vector<1xf32> to vector<1x1xf32>
    %34 = vector.shape_cast %33 : vector<1x1xf32> to vector<1x1x1xf32>
    %35 = vector.broadcast %34 : vector<1x1x1xf32> to vector<1x1x128xf32>
    %c0_12 = arith.constant 0 : index
    %c0_13 = arith.constant 0 : index
    %c0_14 = arith.constant 0 : index
    %36 = vector.load %arg3[%c0_12, %c0_13, %c0_14] : memref<1x1x128xf32, #tpu.memory_space<vmem>>, vector<1x1x128xf32>
    tpu.vector_store %arg3[%c0_12, %c0_13, %c0_14], %35 {strides = array<i32>} : memref<1x1x128xf32, #tpu.memory_space<vmem>>, vector<1x1x128xf32>,
    return
  }
  func.func @transform_0(%arg0: i32) -> (i32, i32) {
    %c0_i32 = arith.constant 0 : i32
    %c0_i32_0 = arith.constant 0 : i32
    return %arg0, %c0_i32 : i32, i32
  }
  func.func @transform_1(%arg0: i32) -> (i32, i32) {
    %c0_i32 = arith.constant 0 : i32
    %c0_i32_0 = arith.constant 0 : i32
    return %arg0, %c0_i32 : i32, i32
  }
  func.func @transform_2(%arg0: i32) -> (i32, i32, i32) {
    %c0_i32 = arith.constant 0 : i32
    %c0_i32_0 = arith.constant 0 : i32
    %c0_i32_1 = arith.constant 0 : i32
    return %arg0, %c0_i32, %c0_i32_0 : i32, i32, i32
  }
}

</mosaic_0001>

<bundles_post_ra>
// kernel: tpu_custom_call.1
= control target key start
LH: loop header
LB: loop body
LE: loop exit
PB: predicated region body
PF: predicated region fallthrough
CT: control target
= control target key end

     0   :  { %vm16_vm0 = vcmask 80896   ;;  %v143_v4 = vmov 0   ;;  %s192_s0 = inlined_call_operand.vmem [shape: f32[16,10], index: 0, kind: input, shape index: {}]   ;;  %s193_s1 = inlined_call_operand.vmem [shape: s32[16,1], index: 1, kind: input, shape index: {}]   ;;  %s194_s2 = inlined_call_operand.hbm [shape: f32[1,1,128], index: 2, kind: output, shape index: {}]  }
   0x1   :  { %v12_v0 = vld [vmem:[%s192_s0] sm:$0xff]  ;;  %v13_v1 = vld [vmem:[%s192_s0 + $0x8] sm:$0xff]  ;;  %105 = vset.pattern.permute.xlu1 %v143_v4  ;;  %106 = vset.pattern.permute.xlu0 %v143_v4 }
   0x2   :  { %v14_v2 = vld [vmem:[%s193_s1] sm:$0xff]  ;;  %v17_v3 = vsel %vm16_vm0, %v12_v0, -inf }
   0x3   :  { %7 = vsyncpa [#allocation3], 0  ;;  %18 = vmax.xlane.f32.xlu0 %v17_v3  ;;  %38 = vperm.xlu1 %105, %v14_v2   ;;  %v20_v5 = vsel %vm16_vm0, %v13_v1, -inf  ;;  %v15_v6 = vld [vmem:[%s193_s1 + $0x8] sm:$0xff]  ;;  %v35_v12 = vlaneseq  ;;  %s144_s0 = smov [#allocation2]  }
   0x4   :  { %s95_s1 = sshll.u32 %s144_s0, 4  ;;  %s96_s1 = int_to_ptr.vmem [resolvable:$true] %s95_s1 }
   0x5   :  { %v36_v14 = vand.u32 127, %v35_v12  ;;  %s119_s17 = scalar_lea.vmem %s96_s1, 16  ;;  %s123_s18 = scalar_lea.vmem %s96_s1, 32 }
   0x6   :  { %p120_p0 = scmp.ne.s32.totalorder %s96_s1, %s119_s17  ;;  %p124_p1 = scmp.lt.s32.totalorder %s96_s1, %s96_s1 }
   0x7   :  { %21 = vmax.xlane.f32.xlu0 %v20_v5  ;;  %41 = vperm.xlu1 %105, %v15_v6   ;;  %p125_p2 = scmp.lt.s32.totalorder %s123_s18, %s119_s17 }
   0x9   :  { %p126_p3 = por %p125_p2, %p124_p1 }
   0xb   :  { %p127_p4 = pnand %p126_p3, %p120_p0 }
  0x82   :  { %v39_v15 = vpop.permute.xlu1 %38 }
  0x83   :  { %vm43_vm1 = vcmp.eq.s32.totalorder %v36_v14, %v39_v15 }
  0x84   :  { %v45_v17 = vsel %vm43_vm1, %v12_v0, 0.0 }
  0x85   :  { %v47_v19 = vsel %vm16_vm0, %v45_v17, 0.0 }
  0x86   :  { %v42_v21 = vpop.permute.xlu1 %41 }
  0x87   :  { %vm44_vm2 = vcmp.eq.s32.totalorder %v36_v14, %v42_v21 }
  0x88   :  { %v46_v27 = vsel %vm44_vm2, %v13_v1, 0.0 }
  0x89   :  { %v50_v28 = vsel %vm16_vm0, %v46_v27, 0.0 }
  0x90   :  { %v19_v7 = vpop.xlane.xlu0 %18 }
  0x91   :  { %v23_v8 = vsub.f32 %v12_v0, %v19_v7 }
  0x93   :  { %v25_v9 = vmul.f32 1.442695, %v23_v8 }
  0x94   :  { %v22_v10 = vpop.xlane.xlu0 %21 }
  0x95   :  { %107 = vpow2.f32 %v25_v9  ;;  %v24_v11 = vsub.f32 %v13_v1, %v22_v10 }
  0x97   :  { %v27_v13 = vmul.f32 1.442695, %v24_v11 }
  0x99   :  { %109 = vpow2.f32 %v27_v13 }
  0x9f   :  { %v108_v16 = vpop.eup %107 }
  0xa0   :  { %v29_v18 = vsel %vm16_vm0, %v108_v16, 0.0  ;;  %v53_v23 = vsel %vm43_vm1, %v108_v16, 0.0 }
  0xa1   :  { %30 = vadd.xlane.f32.xlu0 %v29_v18  ;;  %v55_v24 = vsel %vm16_vm0, %v53_v23, 0.0 }
  0xa3   :  { %v110_v20 = vpop.eup %109 }
  0xa4   :  { %v32_v22 = vsel %vm16_vm0, %v110_v20, 0.0  ;;  %v54_v25 = vsel %vm44_vm2, %v110_v20, 0.0 }
  0xa5   :  { %48 = vadd.xlane.f32.xlu0 %v47_v19  ;;  %33 = vadd.xlane.f32.xlu1 %v32_v22  ;;  %v58_v26 = vsel %vm16_vm0, %v54_v25, 0.0 }
  0xa9   :  { %56 = vadd.xlane.f32.xlu0 %v55_v24 }
  0xad   :  { %59 = vadd.xlane.f32.xlu0 %v58_v26 }
  0xb1   :  { %51 = vadd.xlane.f32.xlu0 %v50_v28 }
 0x12e   :  { %v31_v29 = vpop.xlane.xlu0 %30 }
 0x12f   :  { %111 = vlog2.f32 %v31_v29 }
 0x130   :  { %113 = vrcp.f32 %v31_v29 }
 0x132   :  { %v34_v30 = vpop.xlane.xlu1 %33  ;;  %v49_v31 = vpop.xlane.xlu0 %48 }
 0x133   :  { %115 = vlog2.f32 %v34_v30 }
 0x134   :  { %117 = vrcp.f32 %v34_v30 }
 0x136   :  { %v57_v32 = vpop.xlane.xlu0 %56 }
 0x139   :  { %v112_v33 = vpop.eup %111 }
 0x13a   :  { %v114_v34 = vpop.eup %113  ;;  %v62_v35 = vmul.f32 0.6931472, %v112_v33  ;;  %v60_v36 = vpop.xlane.xlu0 %59 }
 0x13b   :  { %v72_v38 = vmul.f32 %v114_v34, %v57_v32 }
 0x13c   :  { %v65_v37 = vadd.f32 %v62_v35, %v19_v7 }
 0x13d   :  { %v116_v39 = vpop.eup %115  ;;  %v75_v44 = vsub.f32 1.0, %v72_v38 }
 0x13e   :  { %v118_v40 = vpop.eup %117  ;;  %v64_v41 = vmul.f32 0.6931472, %v116_v39  ;;  %v67_v42 = vsub.f32 %v65_v37, %v49_v31  ;;  %v52_v47 = vpop.xlane.xlu0 %51 }
 0x13f   :  { %v74_v43 = vmul.f32 %v118_v40, %v60_v36  ;;  %v77_v50 = vmul.f32 %v75_v44, %v75_v44 }
 0x140   :  { %v66_v45 = vadd.f32 %v64_v41, %v22_v10  ;;  %v69_v48 = vmax.f32 %v67_v42, 0.0 }
 0x141   :  { %v76_v46 = vsub.f32 1.0, %v74_v43 }
 0x142   :  { %v68_v49 = vsub.f32 %v66_v45, %v52_v47  ;;  %v79_v53 = vmul.f32 %v77_v50, %v69_v48 }
 0x143   :  { %v78_v51 = vmul.f32 %v76_v46, %v76_v46 }
 0x144   :  { %v70_v52 = vmax.f32 %v68_v49, 0.0 }
 0x146   :  { %v80_v54 = vmul.f32 %v78_v51, %v70_v52 }
 0x148   :  { %v81_v55 = vadd.f32 %v80_v54, %v79_v53 }
 0x14a   :  { %v82_v56 = vrot.slane %v81_v55, 4 }
 0x14c   :  { %v83_v57 = vadd.f32 %v82_v56, %v81_v55 }
 0x14e   :  { %v84_v58 = vrot.slane %v83_v57, 2 }
 0x150   :  { %v85_v59 = vadd.f32 %v84_v58, %v83_v57 }
 0x152   :  { %v86_v60 = vrot.slane %v85_v59, 1 }
 0x154   :  { %v87_v61 = vadd.f32 %v86_v60, %v85_v59 }
 0x156   :  { %88 = vst [vmem:[#allocation2] sm:$0x1] %v87_v61 }
 0x157   :  { %130 = shalt.err (!%p127_p4)
}
 0x158   :  { %s131_s21 = scalar_lea.hbm %s194_s2, 16 }
 0x159   :  { %p132_p5 = scmp.ne.s32.totalorder %s194_s2, %s131_s21  ;;  %p135_p6 = scmp.lt.u32.totalorder %s131_s21, %s194_s2 }
 0x15b   :  { %p137_p7 = pnand %p135_p6, %p132_p5 }
 0x15d   :  { %140 = shalt.err (!%p137_p7)
}
 0x15e   :  { %98 = dma.vmem_to_hbm [thread:$0]  %s96_s1, 16, %s194_s2, [#allocation3]  }
 0x15f   :  { %141 = dma.done.wait [#allocation3], 16  }
 0x160   :  { %142 = vsyncadd [#allocation3], 4294967280 }
 0x161   :  { %102 = vsyncpa [#allocation3], 1 }

</bundles_post_ra>
